<compile_context>
chip_gen: v7x
topology: tpu7x:2x2x1
jax: 0.10.0
libtpu: 0.0.40
codegen_flags: <defaults>
</compile_context>

<pallas_src>
import functools

import jax
import jax.numpy as jnp
from jax import lax
from jax.experimental import pallas as pl
from jax.experimental.pallas import tpu as pltpu


def _round_up(x, m):
    return ((x + m - 1) // m) * m


def _mmd_tile_kernel(inv_bw_ref, rows_ref, cols_ref, wrow_ref, wcol_ref,
                     out_ref, acc_ref, *, kernel_mul, kernel_num):
    """One (tm, tn) tile of the Gaussian kernel matrix, reduced to a weighted
    partial sum.  Grid = (row_blocks, col_blocks); col axis accumulates."""
    j = pl.program_id(1)

    @pl.when(j == 0)
    def _():
        acc_ref[...] = jnp.zeros_like(acc_ref)

    x_raw = rows_ref[...]                                     # (tm, D)
    y_raw = cols_ref[...]                                     # (tn, D)
    x = x_raw.astype(jnp.float32)
    y = y_raw.astype(jnp.float32)

    # Pairwise squared L2 via MXU Gram matmul: ||xi||^2 + ||yj||^2 - 2 xi.yj
    sq_x = jnp.sum(x * x, axis=1, keepdims=True)              # (tm, 1)
    sq_y = jnp.sum(y * y, axis=1, keepdims=True)              # (tn, 1)
    gram = lax.dot_general(x_raw, y_raw, (((1,), (1,)), ((), ())),
                           preferred_element_type=jnp.float32)  # (tm, tn)
    l2 = sq_x + jnp.transpose(sq_y) - 2.0 * gram
    l2 = jnp.maximum(l2, 0.0)   # Gram form can go slightly negative

    # Multi-bandwidth Gaussian sum: per-element divide replaced by a scalar
    # scale + VPU multiply; accumulator starts from the first term.
    inv_bw = inv_bw_ref[0]                                    # f32 scalar (SMEM)
    kern = jnp.exp(l2 * (-inv_bw))
    for p in range(1, kernel_num):
        scale = inv_bw * float(-1.0 / (kernel_mul ** p))
        kern = kern + jnp.exp(l2 * scale)
    # NOTE: optional exp->sqrt chain (kernel_mul == 2) intentionally skipped to
    # preserve exact exp semantics / tolerance.

    # Folded quadrant means: sum_ab w_a * w_b * K_ab with
    # w = +1/bs (source rows), -1/m (target rows), 0 (padded rows).
    wr = wrow_ref[...]                                        # (tm, 1)
    wc = wcol_ref[...]                                        # (1, tn)
    row_part = jnp.sum(kern * wc, axis=1, keepdims=True)      # (tm, 1)
    acc_ref[...] += jnp.sum(row_part * wr, axis=0, keepdims=True)

    @pl.when(j == pl.num_programs(1) - 1)
    def _():
        out_ref[0] = acc_ref[...].astype(out_ref.dtype)


def mmd_loss_rbf(source, target, kernel_mul=2.0, kernel_num=5):
    """Pallas implementation of MMDLoss(kernel_type='rbf', fix_sigma=None)."""
    bs, d = source.shape
    m = target.shape[0]
    n_total = bs + m

    total = jnp.concatenate([source, target], axis=0)         # (N, D), native dtype

    # ---- O(N*D) analytic bandwidth pre-pass (scalar, fed via SMEM) ----------
    t32 = total.astype(jnp.float32)
    s_norm = jnp.sum(t32 * t32)                               # sum_i ||x_i||^2
    col_sum = jnp.sum(t32, axis=0)                            # (D,)
    sum_l2 = 2.0 * n_total * s_norm - 2.0 * jnp.sum(col_sum * col_sum)
    bandwidth = sum_l2 / float(n_total * n_total - n_total)
    bandwidth = bandwidth / float(kernel_mul ** (kernel_num // 2))
    inv_bw = (1.0 / bandwidth).reshape(1).astype(jnp.float32)

    # ---- tiling / padding ---------------------------------------------------
    if n_total >= 1024:
        tile = 256          # v6e/v7x sweet spot for big N
    elif n_total >= 128:
        tile = 128          # also matches v5e MXU geometry
    else:
        tile = _round_up(n_total, 8)        # tiny case: single full block
    n_pad = _round_up(n_total, tile)
    d_pad = _round_up(d, 128)               # lane-dense feature dim
    nb = n_pad // tile

    total_pad = jnp.pad(total, ((0, n_pad - n_total), (0, d_pad - d)))

    w = jnp.concatenate([
        jnp.full((bs,), 1.0 / bs, dtype=jnp.float32),
        jnp.full((m,), -1.0 / m, dtype=jnp.float32),
        jnp.zeros((n_pad - n_total,), dtype=jnp.float32),
    ])
    w_row = w.reshape(n_pad, 1)
    w_col = w.reshape(1, n_pad)

    kernel = functools.partial(_mmd_tile_kernel,
                               kernel_mul=kernel_mul, kernel_num=kernel_num)

    partials = pl.pallas_call(
        kernel,
        out_shape=jax.ShapeDtypeStruct((nb, 1, 1), jnp.float32),
        grid_spec=pltpu.PrefetchScalarGridSpec(
            num_scalar_prefetch=0,
            grid=(nb, nb),
            in_specs=[
                pl.BlockSpec(memory_space=pltpu.MemorySpace.SMEM),     # inv_bw
                pl.BlockSpec((tile, d_pad), lambda i, j: (i, 0)),      # row block
                pl.BlockSpec((tile, d_pad), lambda i, j: (j, 0)),      # col block
                pl.BlockSpec((tile, 1), lambda i, j: (i, 0)),          # row weights
                pl.BlockSpec((1, tile), lambda i, j: (0, j)),          # col weights
            ],
            out_specs=pl.BlockSpec((1, 1, 1), lambda i, j: (i, 0, 0)),
            scratch_shapes=[pltpu.VMEM((1, 1), jnp.float32)],
        ),
        compiler_params=pltpu.CompilerParams(
            dimension_semantics=("parallel", "arbitrary")),
    )(inv_bw, total_pad, total_pad, w_row, w_col)

    return jnp.sum(partials)


def _mmd_loss_rbf_ref(source, target, kernel_mul=2.0, kernel_num=5):
    """Pure-JAX reference mirroring the PyTorch code path (for validation)."""
    source = source.astype(jnp.float32)
    target = target.astype(jnp.float32)
    bs = source.shape[0]
    total = jnp.concatenate([source, target], axis=0)
    n = total.shape[0]
    diff = total[None, :, :] - total[:, None, :]
    l2 = jnp.sum(diff * diff, axis=2)
    bandwidth = jnp.sum(l2) / (n * n - n)
    bandwidth = bandwidth / (kernel_mul ** (kernel_num // 2))
    kern = sum(jnp.exp(-l2 / (bandwidth * kernel_mul ** i))
               for i in range(kernel_num))
    xx = jnp.mean(kern[:bs, :bs])
    yy = jnp.mean(kern[bs:, bs:])
    xy = jnp.mean(kern[:bs, bs:])
    yx = jnp.mean(kern[bs:, :bs])
    return xx + yy - xy - yx


if __name__ == "__main__":
    key = jax.random.PRNGKey(0)
    k_src, k_tgt = jax.random.split(key)
    batch, feat = 8, 32
    source = jax.random.normal(k_src, (batch, feat), dtype=jnp.float32)
    target = jax.random.normal(k_tgt, (batch, feat), dtype=jnp.float32) + 0.5

    loss = jax.block_until_ready(mmd_loss_rbf(source, target))
    ref = jax.block_until_ready(_mmd_loss_rbf_ref(source, target))

    assert jnp.isfinite(loss), "non-finite MMD loss"
    assert jnp.allclose(loss, ref, rtol=1e-4, atol=1e-4), (loss, ref)
    print("KERNEL_OK")
</pallas_src>

<mosaic_0001>
module attributes {stable_mosaic.version = 11 : i64} {
  func.func @_mmd_tile_kernel(%arg0: i32, %arg1: i32, %arg2: memref<1xf32, #tpu.memory_space<smem>>, %arg3: memref<16x128xf32, #tpu.memory_space<vmem>>, %arg4: memref<16x128xf32, #tpu.memory_space<vmem>>, %arg5: memref<16x1xf32, #tpu.memory_space<vmem>>, %arg6: memref<1x16xf32, #tpu.memory_space<vmem>>, %arg7: memref<1x1x1xf32, #tpu.memory_space<vmem>>, %arg8: memref<1x1xf32, #tpu.memory_space<vmem>>) attributes {dimension_semantics = [#tpu.dimension_semantics<parallel>, #tpu.dimension_semantics<arbitrary>], iteration_bounds = array<i64: 1, 1>, scalar_prefetch = 0 : i64, scratch_operands = 1 : i64, tpu.core_type = #tpu.core_type<tc>, window_params = [{transform_indices = @transform_0, window_bounds = array<i64: 1>}, {transform_indices = @transform_1, window_bounds = array<i64: 16, 128>}, {transform_indices = @transform_2, window_bounds = array<i64: 16, 128>}, {transform_indices = @transform_3, window_bounds = array<i64: 16, 1>}, {transform_indices = @transform_4, window_bounds = array<i64: 1, 16>}, {transform_indices = @transform_5, window_bounds = array<i64: 1, 1, 1>}]} {
    %c0_i32 = arith.constant 0 : i32
    %0 = arith.cmpi eq, %arg1, %c0_i32 : i32
    %1 = arith.extui %0 : i1 to i32
    %c0_i32_0 = arith.constant 0 : i32
    %2 = arith.cmpi ne, %1, %c0_i32_0 : i32
    scf.if %2 {
      %cst_26 = arith.constant 0.000000e+00 : f32
      %61 = vector.broadcast %cst_26 : f32 to vector<1x1xf32>
      %c0_27 = arith.constant 0 : index
      %c0_28 = arith.constant 0 : index
      %62 = vector.load %arg8[%c0_27, %c0_28] : memref<1x1xf32, #tpu.memory_space<vmem>>, vector<1x1xf32>
      tpu.vector_store %arg8[%c0_27, %c0_28], %61 {strides = array<i32>} : memref<1x1xf32, #tpu.memory_space<vmem>>, vector<1x1xf32>,
    } else {
    }
    %c0 = arith.constant 0 : index
    %c0_1 = arith.constant 0 : index
    %3 = vector.load %arg3[%c0, %c0_1] : memref<16x128xf32, #tpu.memory_space<vmem>>, vector<16x128xf32>
    %c0_2 = arith.constant 0 : index
    %c0_3 = arith.constant 0 : index
    %4 = vector.load %arg4[%c0_2, %c0_3] : memref<16x128xf32, #tpu.memory_space<vmem>>, vector<16x128xf32>
    %5 = arith.mulf %3, %3 : vector<16x128xf32>
    %cst = arith.constant dense<0.000000e+00> : vector<16xf32>
    %6 = vector.multi_reduction <add>, %5, %cst [1] : vector<16x128xf32> to vector<16xf32>
    %7 = vector.shape_cast %6 : vector<16xf32> to vector<16x1xf32>
    %8 = arith.mulf %4, %4 : vector<16x128xf32>
    %cst_4 = arith.constant dense<0.000000e+00> : vector<16xf32>
    %9 = vector.multi_reduction <add>, %8, %cst_4 [1] : vector<16x128xf32> to vector<16xf32>
    %10 = vector.shape_cast %9 : vector<16xf32> to vector<16x1xf32>
    %cst_5 = arith.constant dense<0.000000e+00> : vector<16x16xf32>
    %11 = tpu.matmul %3, %4, %cst_5 {dimension_numbers = #tpu.dot_dimension_numbers<[1], [1], [0], [0], [0, 0, 1, 0], [], []>} : vector<16x128xf32>, vector<16x128xf32>, vector<16x16xf32> -> vector<16x16xf32>
    %12 = tpu.transpose %10, [1, 0] : vector<16x1xf32> -> vector<1x16xf32>
    %13 = vector.broadcast %7 : vector<16x1xf32> to vector<16x16xf32>
    %14 = vector.broadcast %12 : vector<1x16xf32> to vector<16x16xf32>
    %15 = arith.addf %13, %14 : vector<16x16xf32>
    %cst_6 = arith.constant 2.000000e+00 : f32
    %16 = vector.broadcast %cst_6 : f32 to vector<16x16xf32>
    %17 = arith.mulf %16, %11 : vector<16x16xf32>
    %18 = arith.subf %15, %17 : vector<16x16xf32>
    %cst_7 = arith.constant 0.000000e+00 : f32
    %19 = vector.broadcast %cst_7 : f32 to vector<16x16xf32>
    %20 = arith.maximumf %18, %19 : vector<16x16xf32>
    %c0_8 = arith.constant 0 : index
    %21 = memref.load %arg2[%c0_8] : memref<1xf32, #tpu.memory_space<smem>>
    %cst_9 = arith.constant 0.000000e+00 : f32
    %22 = arith.subf %cst_9, %21 : f32
    %23 = vector.broadcast %22 : f32 to vector<16x16xf32>
    %24 = arith.mulf %20, %23 : vector<16x16xf32>
    %25 = math.exp %24 : vector<16x16xf32>
    %cst_10 = arith.constant -5.000000e-01 : f32
    %26 = arith.mulf %21, %cst_10 : f32
    %27 = vector.broadcast %26 : f32 to vector<16x16xf32>
    %28 = arith.mulf %20, %27 : vector<16x16xf32>
    %29 = math.exp %28 : vector<16x16xf32>
    %30 = arith.addf %25, %29 : vector<16x16xf32>
    %cst_11 = arith.constant -2.500000e-01 : f32
    %31 = arith.mulf %21, %cst_11 : f32
    %32 = vector.broadcast %31 : f32 to vector<16x16xf32>
    %33 = arith.mulf %20, %32 : vector<16x16xf32>
    %34 = math.exp %33 : vector<16x16xf32>
    %35 = arith.addf %30, %34 : vector<16x16xf32>
    %cst_12 = arith.constant -1.250000e-01 : f32
    %36 = arith.mulf %21, %cst_12 : f32
    %37 = vector.broadcast %36 : f32 to vector<16x16xf32>
    %38 = arith.mulf %20, %37 : vector<16x16xf32>
    %39 = math.exp %38 : vector<16x16xf32>
    %40 = arith.addf %35, %39 : vector<16x16xf32>
    %cst_13 = arith.constant -6.250000e-02 : f32
    %41 = arith.mulf %21, %cst_13 : f32
    %42 = vector.broadcast %41 : f32 to vector<16x16xf32>
    %43 = arith.mulf %20, %42 : vector<16x16xf32>
    %44 = math.exp %43 : vector<16x16xf32>
    %45 = arith.addf %40, %44 : vector<16x16xf32>
    %c0_14 = arith.constant 0 : index
    %c0_15 = arith.constant 0 : index
    %46 = vector.load %arg5[%c0_14, %c0_15] : memref<16x1xf32, #tpu.memory_space<vmem>>, vector<16x1xf32>
    %c0_16 = arith.constant 0 : index
    %c0_17 = arith.constant 0 : index
    %47 = vector.load %arg6[%c0_16, %c0_17] : memref<1x16xf32, #tpu.memory_space<vmem>>, vector<1x16xf32>
    %48 = vector.broadcast %47 : vector<1x16xf32> to vector<16x16xf32>
    %49 = arith.mulf %45, %48 : vector<16x16xf32>
    %cst_18 = arith.constant dense<0.000000e+00> : vector<16xf32>
    %50 = vector.multi_reduction <add>, %49, %cst_18 [1] : vector<16x16xf32> to vector<16xf32>
    %51 = vector.shape_cast %50 : vector<16xf32> to vector<16x1xf32>
    %c0_19 = arith.constant 0 : index
    %c0_20 = arith.constant 0 : index
    %52 = vector.load %arg8[%c0_19, %c0_20] : memref<1x1xf32, #tpu.memory_space<vmem>>, vector<1x1xf32>
    %53 = arith.mulf %51, %46 : vector<16x1xf32>
    %cst_21 = arith.constant dense<0.000000e+00> : vector<1xf32>
    %54 = vector.multi_reduction <add>, %53, %cst_21 [0] : vector<16x1xf32> to vector<1xf32>
    %55 = vector.shape_cast %54 : vector<1xf32> to vector<1x1xf32>
    %56 = arith.addf %52, %55 : vector<1x1xf32>
    %c0_22 = arith.constant 0 : index
    %c0_23 = arith.constant 0 : index
    %57 = vector.load %arg8[%c0_22, %c0_23] : memref<1x1xf32, #tpu.memory_space<vmem>>, vector<1x1xf32>
    tpu.vector_store %arg8[%c0_22, %c0_23], %56 {strides = array<i32>} : memref<1x1xf32, #tpu.memory_space<vmem>>, vector<1x1xf32>,
    %c0_i32_24 = arith.constant 0 : i32
    %58 = arith.cmpi eq, %arg1, %c0_i32_24 : i32
    %59 = arith.extui %58 : i1 to i32
    %c0_i32_25 = arith.constant 0 : i32
    %60 = arith.cmpi ne, %59, %c0_i32_25 : i32
    scf.if %60 {
      %c0_26 = arith.constant 0 : index
      %c0_27 = arith.constant 0 : index
      %61 = vector.load %arg8[%c0_26, %c0_27] : memref<1x1xf32, #tpu.memory_space<vmem>>, vector<1x1xf32>
      %c0_28 = arith.constant 0 : index
      %c0_29 = arith.constant 0 : index
      %c0_30 = arith.constant 0 : index
      %62 = vector.load %arg7[%c0_28, %c0_29, %c0_30] : memref<1x1x1xf32, #tpu.memory_space<vmem>>, vector<1x1x1xf32>
      %63 = vector.shape_cast %62 : vector<1x1x1xf32> to vector<1x1xf32>
      %64 = vector.shape_cast %61 : vector<1x1xf32> to vector<1x1x1xf32>
      tpu.vector_store %arg7[%c0_28, %c0_29, %c0_30], %64 {strides = array<i32>} : memref<1x1x1xf32, #tpu.memory_space<vmem>>, vector<1x1x1xf32>,
    } else {
    }
    return
  }
  func.func @transform_0(%arg0: i32, %arg1: i32) -> i32 {
    %c0_i32 = arith.constant 0 : i32
    %c0_i32_0 = arith.constant 0 : i32
    return %c0_i32 : i32
  }
  func.func @transform_1(%arg0: i32, %arg1: i32) -> (i32, i32) {
    %c0_i32 = arith.constant 0 : i32
    %c0_i32_0 = arith.constant 0 : i32
    return %arg0, %c0_i32 : i32, i32
  }
  func.func @transform_2(%arg0: i32, %arg1: i32) -> (i32, i32) {
    %c0_i32 = arith.constant 0 : i32
    %c0_i32_0 = arith.constant 0 : i32
    return %arg1, %c0_i32 : i32, i32
  }
  func.func @transform_3(%arg0: i32, %arg1: i32) -> (i32, i32) {
    %c0_i32 = arith.constant 0 : i32
    %c0_i32_0 = arith.constant 0 : i32
    return %arg0, %c0_i32 : i32, i32
  }
  func.func @transform_4(%arg0: i32, %arg1: i32) -> (i32, i32) {
    %c0_i32 = arith.constant 0 : i32
    %c0_i32_0 = arith.constant 0 : i32
    return %c0_i32, %arg1 : i32, i32
  }
  func.func @transform_5(%arg0: i32, %arg1: i32) -> (i32, i32, i32) {
    %c0_i32 = arith.constant 0 : i32
    %c0_i32_0 = arith.constant 0 : i32
    %c0_i32_1 = arith.constant 0 : i32
    return %arg0, %c0_i32, %c0_i32_0 : i32, i32, i32
  }
}

</mosaic_0001>

<bundles_post_ra>
// kernel: tpu_custom_call.1
= control target key start
LH: loop header
LB: loop body
LE: loop exit
PB: predicated region body
PF: predicated region fallthrough
CT: control target
= control target key end

     0   :  { %11 = vsyncpa [#allocation5], 0  ;;  %s461_s0 = inlined_call_operand.<no memory space> [shape: f32[1], index: 0, kind: input, shape index: {}]   ;;  %s462_s1 = inlined_call_operand.vmem [shape: f32[16,128], index: 1, kind: input, shape index: {}]   ;;  %s463_s2 = inlined_call_operand.hbm [shape: f32[16,128], index: 2, kind: input, shape index: {}]   ;;  %s464_s3 = inlined_call_operand.vmem [shape: f32[16,1], index: 3, kind: input, shape index: {}]   ;;  %s465_s4 = inlined_call_operand.vmem [shape: f32[1,16], index: 4, kind: input, shape index: {}]   ;;  %s466_s5 = inlined_call_operand.hbm [shape: f32[1,1,1], index: 5, kind: output, shape index: {}]  }
   0x1   :  { %12 = vsyncpa [#allocation6], 0  ;;  %s369_s18 = smov [#allocation4]   ;;  %s321_s22 = scalar_lea.hbm %s463_s2, 256 }
   0x2   :  { %s22_s19 = sshll.u32 %s369_s18, 4  ;;  %p322_p0 = scmp.ne.s32.totalorder %s463_s2, %s321_s22  ;;  %s23_s19 = int_to_ptr.vmem [resolvable:$true] %s22_s19 }
   0x3   :  { %p325_p1 = scmp.lt.u32.totalorder %s321_s22, %s463_s2 }
   0x5   :  { %p327_p2 = pnand %p325_p1, %p322_p0 }
   0x7   :  { %330 = shalt.err (!%p327_p2)
}
   0x8   :  { %s331_s27 = scalar_lea.vmem %s23_s19, 256  ;;  %p336_p4 = scmp.lt.s32.totalorder %s23_s19, %s23_s19 }
   0x9   :  { %p332_p3 = scmp.ne.s32.totalorder %s23_s19, %s331_s27  ;;  %p337_p5 = scmp.lt.s32.totalorder %s331_s27, %s331_s27 }
   0xb   :  { %p338_p6 = por %p337_p5, %p336_p4 }
   0xd   :  { %p339_p7 = pnand %p338_p6, %p332_p3 }
   0xf   :  { %342 = shalt.err (!%p339_p7)
}
  0x10   :  { %s370_s28 = smov 128   ;;  %s371_s29 = smov 8  }
  0x11   :  { %28 = dma.hbm_to_vmem [thread:$0]  %s463_s2, 256, %s23_s19, [#allocation5], %s370_s28, %s370_s28, %s371_s29  }
  0x12   :  { %365 = dma.done.wait [#allocation5], 256  }
  0x13   :  { %366 = vsyncadd [#allocation5], 4294967040  ;;  %v44_v0 = vld [vmem:[#allocation4] sm:$0xff]  ;;  %v45_v1 = vld [vmem:[#allocation4 + $0x8] sm:$0xff]  ;;  %v165_v13 = vlaneseq  ;;  %s196_s14 = smul.f32 -0.25, %s461_s0  ;;  %s178_s17 = ssub.f32 0.0, %s461_s0 }
  0x14   :  { %v42_v2 = vld [vmem:[%s462_s1] sm:$0xff]  ;;  %v52_v3 = vmul.f32 %v44_v0, %v44_v0  ;;  %v292_v4 = vpack.c.bf16 %v45_v1, %v44_v0  ;;  %v53_v6 = vmul.f32 %v45_v1, %v45_v1  ;;  %v43_v7 = vld [vmem:[%s462_s1 + $0x8] sm:$0xff]  ;;  %s186_s1 = smul.f32 -0.5, %s461_s0  ;;  %vm237_vm0 = vcmask 130048   ;;  %s373_s28 = smov [#allocation7]  }
  0x15   :  { %289 = vmatprep.mubr.f32.mxu0 %v42_v2  ;;  %v46_v5 = vmul.f32 %v42_v2, %v42_v2  ;;  %v47_v8 = vmul.f32 %v43_v7, %v43_v7  ;;  %v166_v14 = vshrl.u32 %v165_v13, 7  ;;  %s206_s20 = smul.f32 -0.125, %s461_s0  ;;  %v179_v26 = vstv %s178_s17  ;;  %v280_v1 = vld [vmem:[%s465_s4] ss:$0 sm:$0xff]  ;;  %s271_s29 = sshll.u32 %s373_s28, 4  ;;  %s272_s29 = int_to_ptr.vmem [resolvable:$true] %s271_s29 }
  0x16   :  { %54 = vadd.xlane.f32.xlu0 %v52_v3  ;;  %293 = vmatprep.subr.bf16.mxu0 %v292_v4  ;;  %v187_v27 = vstv %s186_s1  ;;  %v197_v28 = vstv %s196_s14  ;;  %s216_s23 = smul.f32 -0.0625, %s461_s0  ;;  %vm40_vm1 = vcmask 0   ;;  %v226_v13 = vld [vmem:[%s464_s3] sm:$0xff]  ;;  %vm247_vm2 = vcmask 7168   ;;  %s347_s30 = scalar_lea.vmem %s272_s29, 32 }
  0x17   :  { %295 = vmatpush3.bf16.xpose.msra.mxu0 %v292_v4  ;;  %48 = vadd.xlane.f32.xlu1 %v46_v5  ;;  %v167_v16 = vsub.s32 0, %v166_v14  ;;  %v207_v29 = vstv %s206_s20  ;;  %p348_p9 = scmp.lt.s32.totalorder %s272_s29, %s272_s29 }
  0x18   :  { %v217_v36 = vstv %s216_s23 }
  0x1a   :  { %56 = vadd.xlane.f32.xlu0 %v53_v6 }
  0x1b   :  { %50 = vadd.xlane.f32.xlu1 %v47_v8 }
  0x1e   :  { %290 = vmatmul.mubr.f32.vlgmr.msra.gmra.mrb[0].mxu0 %v43_v7 }
  0xa3   :  { %v55_v9 = vpop.xlane.xlu0 %54 }
  0xa4   :  { %133 = vxpose.xlu0.b32.start [1/2] (short) (narrow) %v55_v9, 8  ;;  %v49_v15 = vpop.xlane.xlu1 %48 }
  0xa7   :  { %v57_v10 = vpop.xlane.xlu0 %56 }
  0xa8   :  { %134 = vxpose.xlu0.b32.end [2/2] (short) (narrow) %v57_v10, 8  ;;  %v51_v18 = vpop.xlane.xlu1 %50 }
  0xf1   :  { %v291_v11 = vpop.f32.mrb[0].mxu0 }
  0xf2   :  { %v124_v12 = vpop.f32.mrb[1].mxu0  ;;  %v172_v20 = vmul.f32 2.0, %v291_v11 }
  0xf3   :  { %v171_v21 = vmul.f32 2.0, %v124_v12  ;;  %v372_v12 = vmov 0.0  }
  0xf4   :  { %41 = vst.msk [vmem:[#allocation2] sm:$0x1] %vm40_vm1, %v372_v12 }
 0x124   :  { %v149_v17 = vpop.trf.xlu0 }
 0x125   :  { %v168_v19 = vrot.slane %v149_v17, %v167_v16 }
 0x127   :  { %v169_v22 = vadd.f32 %v168_v19, %v49_v15  ;;  %v170_v23 = vadd.f32 %v168_v19, %v51_v18  ;;  %v227_v15 = vld [vmem:[%s464_s3 + $0x8] sm:$0xff]  ;;  %s343_s3 = scalar_lea.vmem %s272_s29, 16 }
 0x128   :  { %p344_p8 = scmp.ne.s32.totalorder %s272_s29, %s343_s3  ;;  %p349_p10 = scmp.lt.s32.totalorder %s347_s30, %s343_s3 }
 0x129   :  { %v173_v24 = vsub.f32 %v169_v22, %v171_v21  ;;  %v174_v25 = vsub.f32 %v170_v23, %v172_v20 }
 0x12a   :  { %p350_p11 = por %p349_p10, %p348_p9 }
 0x12b   :  { %v175_v30 = vmax.f32 %v173_v24, 0.0  ;;  %v176_v31 = vmax.f32 %v174_v25, 0.0 }
 0x12c   :  { %p351_p12 = pnand %p350_p11, %p344_p8 }
 0x12d   :  { %v180_v32 = vmul.f32 %v179_v26, %v175_v30  ;;  %v188_v33 = vmul.f32 %v187_v27, %v175_v30  ;;  %v198_v34 = vmul.f32 %v197_v28, %v175_v30  ;;  %v208_v35 = vmul.f32 %v207_v29, %v175_v30 }
 0x12e   :  { %v181_v37 = vmul.f32 %v179_v26, %v176_v31  ;;  %v189_v38 = vmul.f32 %v187_v27, %v176_v31  ;;  %v199_v43 = vmul.f32 %v197_v28, %v176_v31  ;;  %v218_v44 = vmul.f32 %v217_v36, %v175_v30  ;;  %v244_v27 = vld [vmem:[#allocation2] sm:$0x1] }
 0x12f   :  { %v182_v39 = vmul.f32 1.442695, %v180_v32  ;;  %v190_v40 = vmul.f32 1.442695, %v188_v33  ;;  %v200_v41 = vmul.f32 1.442695, %v198_v34  ;;  %v209_v47 = vmul.f32 %v207_v29, %v176_v31 }
 0x130   :  { %v210_v42 = vmul.f32 1.442695, %v208_v35  ;;  %v184_v45 = vmul.f32 1.442695, %v181_v37  ;;  %v192_v46 = vmul.f32 1.442695, %v189_v38  ;;  %v219_v49 = vmul.f32 %v217_v36, %v176_v31 }
 0x131   :  { %301 = vpow2.f32 %v182_v39  ;;  %v202_v48 = vmul.f32 1.442695, %v199_v43  ;;  %v220_v50 = vmul.f32 1.442695, %v218_v44  ;;  %v212_v51 = vmul.f32 1.442695, %v209_v47 }
 0x132   :  { %303 = vpow2.f32 %v190_v40  ;;  %v222_v52 = vmul.f32 1.442695, %v219_v49 }
 0x133   :  { %305 = vpow2.f32 %v200_v41 }
 0x134   :  { %307 = vpow2.f32 %v210_v42 }
 0x135   :  { %309 = vpow2.f32 %v184_v45 }
 0x136   :  { %311 = vpow2.f32 %v192_v46 }
 0x137   :  { %313 = vpow2.f32 %v202_v48 }
 0x138   :  { %315 = vpow2.f32 %v220_v50 }
 0x139   :  { %317 = vpow2.f32 %v212_v51 }
 0x13a   :  { %319 = vpow2.f32 %v222_v52 }
 0x13b   :  { %v302_v53 = vpop.eup %301 }
 0x13c   :  { %v304_v54 = vpop.eup %303 }
 0x13d   :  { %v306_v55 = vpop.eup %305  ;;  %v194_v56 = vadd.f32 %v304_v54, %v302_v53 }
 0x13e   :  { %v308_v57 = vpop.eup %307 }
 0x13f   :  { %v310_v58 = vpop.eup %309  ;;  %v204_v59 = vadd.f32 %v306_v55, %v194_v56 }
 0x140   :  { %v312_v60 = vpop.eup %311 }
 0x141   :  { %v214_v61 = vadd.f32 %v308_v57, %v204_v59  ;;  %v195_v62 = vadd.f32 %v312_v60, %v310_v58  ;;  %v314_v63 = vpop.eup %313 }
 0x142   :  { %v316_v0 = vpop.eup %315 }
 0x143   :  { %v205_v2 = vadd.f32 %v314_v63, %v195_v62  ;;  %v318_v3 = vpop.eup %317  ;;  %v224_v4 = vadd.f32 %v316_v0, %v214_v61 }
 0x144   :  { %v320_v6 = vpop.eup %319 }
 0x145   :  { %v215_v5 = vadd.f32 %v318_v3, %v205_v2  ;;  %v235_v7 = vmul.f32 %v280_v1, %v224_v4 }
 0x147   :  { %v225_v8 = vadd.f32 %v320_v6, %v215_v5  ;;  %v238_v9 = vsel %vm237_vm0, %v235_v7, 0.0 }
 0x148   :  { %239 = vadd.xlane.f32.xlu1 %v238_v9 }
 0x149   :  { %v236_v10 = vmul.f32 %v280_v1, %v225_v8 }
 0x14b   :  { %v241_v11 = vsel %vm237_vm0, %v236_v10, 0.0 }
 0x14c   :  { %242 = vadd.xlane.f32.xlu1 %v241_v11 }
 0x1d5   :  { %v240_v14 = vpop.xlane.xlu1 %239 }
 0x1d6   :  { %v245_v16 = vmul.f32 %v240_v14, %v226_v13 }
 0x1d8   :  { %v248_v19 = vsel %vm247_vm2, %v245_v16, 0.0 }
 0x1d9   :  { %v243_v17 = vpop.xlane.xlu1 %242 }
 0x1da   :  { %v246_v18 = vmul.f32 %v243_v17, %v227_v15 }
 0x1dc   :  { %v249_v20 = vsel %vm247_vm2, %v246_v18, 0.0 }
 0x1dd   :  { %v250_v21 = vadd.f32 %v249_v20, %v248_v19 }
 0x1df   :  { %v251_v22 = vrot.slane %v250_v21, 4 }
 0x1e1   :  { %v252_v23 = vadd.f32 %v251_v22, %v250_v21 }
 0x1e3   :  { %v253_v24 = vrot.slane %v252_v23, 2 }
 0x1e5   :  { %v254_v25 = vadd.f32 %v253_v24, %v252_v23 }
 0x1e7   :  { %v255_v26 = vrot.slane %v254_v25, 1 }
 0x1e9   :  { %v256_v28 = vadd.f32 %v255_v26, %v254_v25 }
 0x1eb   :  { %v257_v29 = vadd.f32 %v256_v28, %v244_v27 }
 0x1ed   :  { %259 = vst.msk [vmem:[#allocation2] sm:$0x1] %vm40_vm1, %v257_v29 }
 0x1f4   :  { %v263_v30 = vld [vmem:[#allocation2] sm:$0x1] }
 0x1f5   :  { %264 = vst.msk [vmem:[#allocation7] sm:$0x1] %vm40_vm1, %v263_v30 }
 0x1f6   :  { %354 = shalt.err (!%p351_p12)
}
 0x1f7   :  { %s355_s8 = scalar_lea.hbm %s466_s5, 16 }
 0x1f8   :  { %p356_p13 = scmp.ne.s32.totalorder %s466_s5, %s355_s8  ;;  %p359_p0 = scmp.lt.u32.totalorder %s355_s8, %s466_s5 }
 0x1fa   :  { %p361_p1 = pnand %p359_p0, %p356_p13 }
 0x1fc   :  { %364 = shalt.err (!%p361_p1)
}
 0x1fd   :  { %274 = dma.vmem_to_hbm [thread:$0]  %s272_s29, 16, %s466_s5, [#allocation6]  }
 0x1fe   :  { %367 = dma.done.wait [#allocation6], 16  }
 0x1ff   :  { %368 = vsyncadd [#allocation6], 4294967280 }
 0x200   :  { %278 = vsyncpa [#allocation5], 1 }
 0x201   :  { %279 = vsyncpa [#allocation6], 1 }

</bundles_post_ra>
